<compile_context>
chip_gen: v7x
topology: tpu7x:2x2x1
jax: 0.10.0
libtpu: 0.0.40
codegen_flags: <defaults>
</compile_context>

<pallas_src>
import jax
import jax.numpy as jnp
from jax import lax
from jax.experimental import pallas as pl
from jax.experimental.pallas import tpu as pltpu


_LANE = 128
_SUB = 8


def _cdiv(a, b):
    return -(-a // b)


def _round_up(a, m):
    return _cdiv(a, m) * m


def _round_down(a, m):
    return (a // m) * m


def _vmem_capacity_bytes():
    try:
        return int(pltpu.get_tpu_info().vmem_capacity_bytes)
    except Exception:
        return 64 * (1 << 20)  # conservative (v7x-sized) fallback


def _pick_tiles(R, HW, itemsize, budget):
    """Choose (tile_r, tile_hw) for lane/sublane-dense blocks within `budget` bytes.

    Full-extent dims are exempt from the (8,128) divisibility rule, so when 8
    full-HW rows fit the budget we use tile_hw = HW (no padding, no masking,
    long contiguous DMA runs)."""
    if _SUB * HW * itemsize <= budget:
        tile_hw = HW
        max_tr = max(_SUB, _round_down(budget // (HW * itemsize), _SUB))
    else:
        tile_hw = max(_LANE, _round_down(budget // (_SUB * itemsize), _LANE))
        max_tr = _SUB

    if R <= _SUB:
        tile_r = R  # full extent (exempt from multiple-of-8)
    else:
        # Keep >= 2 row blocks so both v7x TensorCores get work on the
        # row-parallel axis (harmless on single-TC v5e/v6e).
        cap = _round_up(_cdiv(R, 2), _SUB) if R >= 2 * _SUB else _SUB
        tile_r = max(_SUB, min(max_tr, cap))

    return tile_r, tile_hw


def _make_stats_kernel(hw, tile_hw, need_mask):
    """Per-row sum(x - m0) and sum((x - m0)^2), reduced over the hw grid axis."""

    def kernel(x_ref, m0_ref, s1_ref, s2_ref):
        t = pl.program_id(1)

        @pl.when(t == 0)
        def _():
            s1_ref[...] = jnp.zeros_like(s1_ref)
            s2_ref[...] = jnp.zeros_like(s2_ref)

        x = x_ref[...].astype(jnp.float32) - m0_ref[...]
        if need_mask:
            # ragged final hw tile: zero out the out-of-bounds lanes so they do
            # not perturb the sums (garbage reads are otherwise unspecified).
            col = t * tile_hw + lax.broadcasted_iota(jnp.int32, x.shape, 1)
            x = jnp.where(col < hw, x, 0.0)
        s1_ref[...] += jnp.sum(x, axis=1, keepdims=True)
        s2_ref[...] += jnp.sum(x * x, axis=1, keepdims=True)

    return kernel


def _affine_kernel(x_ref, a_ref, b_ref, o_ref):
    """Streaming elementwise: out = a * x + b with per-row (= per (n,c)) scale/bias."""
    x = x_ref[...].astype(jnp.float32)
    o_ref[...] = (a_ref[...] * x + b_ref[...]).astype(o_ref.dtype)


def cond_batch_norm_2d(x, gamma, beta, *, avg_mean, avg_var, gamma_, beta_,
                       eps=2e-05, decay=0.9, training=True):
    """Functional forward. Returns (out, new_avg_mean, new_avg_var)."""
    N, C, H, W = x.shape
    R, HW = N * C, H * W
    x2 = x.reshape(R, HW)                       # contiguous view, no data movement
    itemsize = jnp.dtype(x.dtype).itemsize

    vmem_cap = _vmem_capacity_bytes()
    big_vmem = vmem_cap >= 100 * (1 << 20)      # 128-MiB-VMEM class (v5e / v6e)
    budget = (12 if big_vmem else 6) * (1 << 20)
    vmem_limit = (96 if big_vmem else 48) * (1 << 20)

    tile_r, tile_hw = _pick_tiles(R, HW, itemsize, budget)
    num_r = _cdiv(R, tile_r)
    num_hw = _cdiv(HW, tile_hw)
    need_mask = (HW % tile_hw) != 0

    gamma32 = gamma.astype(jnp.float32)
    beta32 = beta.astype(jnp.float32)
    avg_mean = avg_mean.astype(jnp.float32)
    avg_var = avg_var.astype(jnp.float32)
    gamma_ = gamma_.astype(jnp.float32)
    beta_ = beta_.astype(jnp.float32)

    new_mean, new_var = avg_mean, avg_var

    if training:
        cnt = float(N * HW)
        # Pilot (shift) mean per row = running mean per channel; keeps the
        # single-pass sum / sum-of-squares numerically robust to large offsets.
        m0_rows = jnp.broadcast_to(avg_mean[None, :], (N, C)).reshape(R, 1)

        stats_cost = pl.CostEstimate(
            flops=4 * R * HW,
            transcendentals=0,
            bytes_accessed=int(R * HW * itemsize + 3 * R * 4))

        s1, s2 = pl.pallas_call(
            _make_stats_kernel(HW, tile_hw, need_mask),
            out_shape=(jax.ShapeDtypeStruct((R, 1), jnp.float32),
                       jax.ShapeDtypeStruct((R, 1), jnp.float32)),
            grid=(num_r, num_hw),
            in_specs=[
                pl.BlockSpec((tile_r, tile_hw), lambda i, t: (i, t)),
                pl.BlockSpec((tile_r, 1), lambda i, t: (i, 0)),
            ],
            out_specs=(
                pl.BlockSpec((tile_r, 1), lambda i, t: (i, 0)),
                pl.BlockSpec((tile_r, 1), lambda i, t: (i, 0)),
            ),
            compiler_params=pltpu.CompilerParams(
                dimension_semantics=("parallel", "arbitrary"),
                vmem_limit_bytes=vmem_limit),
            cost_estimate=stats_cost,
        )(x2, m0_rows)

        s1c = s1.reshape(N, C).sum(axis=0)       # per-channel sum(x - m0)
        s2c = s2.reshape(N, C).sum(axis=0)       # per-channel sum((x - m0)^2)
        d = s1c / cnt
        mean = avg_mean + d                      # batch mean
        var = jnp.maximum(s2c / cnt - d * d, 0.0)  # biased batch variance
        unbiased = var * (cnt / max(cnt - 1.0, 1.0))
        new_mean = (1.0 - decay) * avg_mean + decay * mean
        new_var = (1.0 - decay) * avg_var + decay * unbiased
    else:
        mean, var = avg_mean, avg_var

    # Fold batch_norm (gamma_, beta_, mean, inv_std) and the conditional affine
    # (gamma, beta) into one per-(n, c) scale / bias:  out = a * x + b.
    inv_std = lax.rsqrt(var + eps)               # (C,)
    g_eff = gamma_ * inv_std                     # (C,)
    b_eff = beta_ - g_eff * mean                 # (C,)
    a_rows = (gamma32 * g_eff[None, :]).reshape(R, 1)
    b_rows = (beta32 + gamma32 * b_eff[None, :]).reshape(R, 1)

    affine_cost = pl.CostEstimate(
        flops=2 * R * HW,
        transcendentals=0,
        bytes_accessed=int(2 * R * HW * itemsize + 2 * R * 4))

    out = pl.pallas_call(
        _affine_kernel,
        out_shape=jax.ShapeDtypeStruct((R, HW), x.dtype),
        grid=(num_r, num_hw),
        in_specs=[
            pl.BlockSpec((tile_r, tile_hw), lambda i, t: (i, t)),
            pl.BlockSpec((tile_r, 1), lambda i, t: (i, 0)),
            pl.BlockSpec((tile_r, 1), lambda i, t: (i, 0)),
        ],
        out_specs=pl.BlockSpec((tile_r, tile_hw), lambda i, t: (i, t)),
        compiler_params=pltpu.CompilerParams(
            dimension_semantics=("parallel", "parallel"),
            vmem_limit_bytes=vmem_limit),
        cost_estimate=affine_cost,
    )(x2, a_rows, b_rows)

    return out.reshape(N, C, H, W), new_mean, new_var


class CondBatchNorm2d:
    """JAX/Pallas port of the PyTorch CondBatchNorm2d module (forward only)."""

    def __init__(self, size, decay=0.9, eps=2e-05):
        self.size = size
        self.eps = eps
        self.decay = decay
        self.avg_mean = jnp.zeros((size,), jnp.float32)
        self.avg_var = jnp.ones((size,), jnp.float32)
        self.gamma_ = jnp.ones((size,), jnp.float32)
        self.beta_ = jnp.zeros((size,), jnp.float32)
        self.training = True

    def __call__(self, x, gamma, beta):
        out, new_mean, new_var = cond_batch_norm_2d(
            x, gamma, beta,
            avg_mean=self.avg_mean, avg_var=self.avg_var,
            gamma_=self.gamma_, beta_=self.beta_,
            eps=self.eps, decay=self.decay, training=self.training)
        if self.training:
            # Eager (un-jitted) buffer update.  If you want to jit, wrap
            # `cond_batch_norm_2d` and thread the buffers functionally instead
            # of mutating the module.
            self.avg_mean = new_mean
            self.avg_var = new_var
        return out


if __name__ == "__main__":
    key = jax.random.PRNGKey(0)
    kx, kg, kb = jax.random.split(key, 3)

    N, C, H, W = 2, 4, 16, 16
    x = jax.random.normal(kx, (N, C, H, W), dtype=jnp.float32)
    gamma = 1.0 + 0.1 * jax.random.normal(kg, (N, C), dtype=jnp.float32)
    beta = 0.1 * jax.random.normal(kb, (N, C), dtype=jnp.float32)

    bn = CondBatchNorm2d(C)
    out = bn(x, gamma, beta)
    out = jax.block_until_ready(out)

    # pure-JAX reference (training-mode batch_norm with gamma_=1, beta_=0)
    mean = x.mean(axis=(0, 2, 3), keepdims=True)
    var = ((x - mean) ** 2).mean(axis=(0, 2, 3), keepdims=True)  # biased
    feature = (x - mean) / jnp.sqrt(var + bn.eps)
    ref = gamma[:, :, None, None] * feature + beta[:, :, None, None]

    assert out.shape == (N, C, H, W)
    assert jnp.allclose(out, ref, atol=5e-4, rtol=5e-4), "output mismatch vs reference"

    # running-buffer update check (momentum = decay, unbiased var)
    cnt = N * H * W
    ref_mean_c = mean.reshape(C)
    ref_var_u = var.reshape(C) * cnt / (cnt - 1)
    ref_avg_mean = 0.1 * 0.0 + 0.9 * ref_mean_c
    ref_avg_var = 0.1 * 1.0 + 0.9 * ref_var_u
    assert jnp.allclose(bn.avg_mean, ref_avg_mean, atol=1e-4, rtol=1e-4), "avg_mean mismatch"
    assert jnp.allclose(bn.avg_var, ref_avg_var, atol=1e-4, rtol=1e-4), "avg_var mismatch"

    print("KERNEL_OK")
</pallas_src>

<mosaic_0001>
module attributes {stable_mosaic.version = 11 : i64} {
  func.func @kernel(%arg0: i32, %arg1: i32, %arg2: memref<8x256xf32, #tpu.memory_space<vmem>>, %arg3: memref<8x1xf32, #tpu.memory_space<vmem>>, %arg4: memref<8x1xf32, #tpu.memory_space<vmem>>, %arg5: memref<8x1xf32, #tpu.memory_space<vmem>>) attributes {dimension_semantics = [#tpu.dimension_semantics<parallel>, #tpu.dimension_semantics<arbitrary>], iteration_bounds = array<i64: 1, 1>, scalar_prefetch = 0 : i64, scratch_operands = 0 : i64, tpu.core_type = #tpu.core_type<tc>, window_params = [{transform_indices = @transform_0, window_bounds = array<i64: 8, 256>}, {transform_indices = @transform_1, window_bounds = array<i64: 8, 1>}, {transform_indices = @transform_2, window_bounds = array<i64: 8, 1>}, {transform_indices = @transform_3, window_bounds = array<i64: 8, 1>}]} {
    %c0_i32 = arith.constant 0 : i32
    %0 = arith.cmpi eq, %arg1, %c0_i32 : i32
    %1 = arith.extui %0 : i1 to i32
    %c0_i32_0 = arith.constant 0 : i32
    %2 = arith.cmpi ne, %1, %c0_i32_0 : i32
    scf.if %2 {
      %cst_13 = arith.constant 0.000000e+00 : f32
      %18 = vector.broadcast %cst_13 : f32 to vector<8x1xf32>
      %c0_14 = arith.constant 0 : index
      %c0_15 = arith.constant 0 : index
      %19 = vector.load %arg4[%c0_14, %c0_15] : memref<8x1xf32, #tpu.memory_space<vmem>>, vector<8x1xf32>
      tpu.vector_store %arg4[%c0_14, %c0_15], %18 {strides = array<i32>} : memref<8x1xf32, #tpu.memory_space<vmem>>, vector<8x1xf32>,
      %cst_16 = arith.constant 0.000000e+00 : f32
      %20 = vector.broadcast %cst_16 : f32 to vector<8x1xf32>
      %c0_17 = arith.constant 0 : index
      %c0_18 = arith.constant 0 : index
      %21 = vector.load %arg5[%c0_17, %c0_18] : memref<8x1xf32, #tpu.memory_space<vmem>>, vector<8x1xf32>
      tpu.vector_store %arg5[%c0_17, %c0_18], %20 {strides = array<i32>} : memref<8x1xf32, #tpu.memory_space<vmem>>, vector<8x1xf32>,
    } else {
    }
    %c0 = arith.constant 0 : index
    %c0_1 = arith.constant 0 : index
    %3 = vector.load %arg2[%c0, %c0_1] : memref<8x256xf32, #tpu.memory_space<vmem>>, vector<8x256xf32>
    %c0_2 = arith.constant 0 : index
    %c0_3 = arith.constant 0 : index
    %4 = vector.load %arg3[%c0_2, %c0_3] : memref<8x1xf32, #tpu.memory_space<vmem>>, vector<8x1xf32>
    %5 = vector.broadcast %4 : vector<8x1xf32> to vector<8x256xf32>
    %6 = arith.subf %3, %5 : vector<8x256xf32>
    %c0_4 = arith.constant 0 : index
    %c0_5 = arith.constant 0 : index
    %7 = vector.load %arg4[%c0_4, %c0_5] : memref<8x1xf32, #tpu.memory_space<vmem>>, vector<8x1xf32>
    %cst = arith.constant dense<0.000000e+00> : vector<8xf32>
    %8 = vector.multi_reduction <add>, %6, %cst [1] : vector<8x256xf32> to vector<8xf32>
    %9 = vector.shape_cast %8 : vector<8xf32> to vector<8x1xf32>
    %10 = arith.addf %7, %9 : vector<8x1xf32>
    %c0_6 = arith.constant 0 : index
    %c0_7 = arith.constant 0 : index
    %11 = vector.load %arg4[%c0_6, %c0_7] : memref<8x1xf32, #tpu.memory_space<vmem>>, vector<8x1xf32>
    tpu.vector_store %arg4[%c0_6, %c0_7], %10 {strides = array<i32>} : memref<8x1xf32, #tpu.memory_space<vmem>>, vector<8x1xf32>,
    %c0_8 = arith.constant 0 : index
    %c0_9 = arith.constant 0 : index
    %12 = vector.load %arg5[%c0_8, %c0_9] : memref<8x1xf32, #tpu.memory_space<vmem>>, vector<8x1xf32>
    %13 = arith.mulf %6, %6 : vector<8x256xf32>
    %cst_10 = arith.constant dense<0.000000e+00> : vector<8xf32>
    %14 = vector.multi_reduction <add>, %13, %cst_10 [1] : vector<8x256xf32> to vector<8xf32>
    %15 = vector.shape_cast %14 : vector<8xf32> to vector<8x1xf32>
    %16 = arith.addf %12, %15 : vector<8x1xf32>
    %c0_11 = arith.constant 0 : index
    %c0_12 = arith.constant 0 : index
    %17 = vector.load %arg5[%c0_11, %c0_12] : memref<8x1xf32, #tpu.memory_space<vmem>>, vector<8x1xf32>
    tpu.vector_store %arg5[%c0_11, %c0_12], %16 {strides = array<i32>} : memref<8x1xf32, #tpu.memory_space<vmem>>, vector<8x1xf32>,
    return
  }
  func.func @transform_0(%arg0: i32, %arg1: i32) -> (i32, i32) {
    %c0_i32 = arith.constant 0 : i32
    return %arg0, %arg1 : i32, i32
  }
  func.func @transform_1(%arg0: i32, %arg1: i32) -> (i32, i32) {
    %c0_i32 = arith.constant 0 : i32
    %c0_i32_0 = arith.constant 0 : i32
    return %arg0, %c0_i32 : i32, i32
  }
  func.func @transform_2(%arg0: i32, %arg1: i32) -> (i32, i32) {
    %c0_i32 = arith.constant 0 : i32
    %c0_i32_0 = arith.constant 0 : i32
    return %arg0, %c0_i32 : i32, i32
  }
  func.func @transform_3(%arg0: i32, %arg1: i32) -> (i32, i32) {
    %c0_i32 = arith.constant 0 : i32
    %c0_i32_0 = arith.constant 0 : i32
    return %arg0, %c0_i32 : i32, i32
  }
}

</mosaic_0001>

<bundles_post_ra>
// kernel: tpu_custom_call.1
= control target key start
LH: loop header
LB: loop body
LE: loop exit
PB: predicated region body
PF: predicated region fallthrough
CT: control target
= control target key end

     0   :  { %9 = vsyncpa [#allocation3], 0  ;;  %s94_s12 = smov [#allocation2]   ;;  %s154_s0 = inlined_call_operand.hbm [shape: f32[8,256], index: 0, kind: input, shape index: {}]   ;;  %s155_s1 = inlined_call_operand.vmem [shape: f32[8,1], index: 1, kind: input, shape index: {}]   ;;  %s156_s2 = inlined_call_operand.vmem [shape: f32[8,1], index: 2, kind: output, shape index: {0}]   ;;  %s157_s3 = inlined_call_operand.vmem [shape: f32[8,1], index: 3, kind: output, shape index: {1}]  }
   0x1   :  { %s16_s13 = sshll.u32 %s94_s12, 4  ;;  %s70_s16 = scalar_lea.hbm %s154_s0, 256  ;;  %s17_s13 = int_to_ptr.vmem [resolvable:$true] %s16_s13 }
   0x2   :  { %p71_p0 = scmp.ne.s32.totalorder %s154_s0, %s70_s16  ;;  %p74_p1 = scmp.lt.u32.totalorder %s70_s16, %s154_s0 }
   0x4   :  { %p76_p2 = pnand %p74_p1, %p71_p0 }
   0x6   :  { %79 = shalt.err (!%p76_p2)
}
   0x7   :  { %s80_s21 = scalar_lea.vmem %s17_s13, 256  ;;  %p85_p4 = scmp.lt.s32.totalorder %s17_s13, %s17_s13 }
   0x8   :  { %p81_p3 = scmp.ne.s32.totalorder %s17_s13, %s80_s21  ;;  %p86_p5 = scmp.lt.s32.totalorder %s80_s21, %s80_s21 }
   0xa   :  { %p87_p6 = por %p86_p5, %p85_p4 }
   0xc   :  { %p88_p7 = pnand %p87_p6, %p81_p3 }
   0xe   :  { %91 = shalt.err (!%p88_p7)
}
   0xf   :  { %19 = dma.hbm_to_vmem [thread:$0]  %s154_s0, 256, %s17_s13, [#allocation3]  }
  0x10   :  { %92 = dma.done.wait [#allocation3], 256  }
  0x11   :  { %93 = vsyncadd [#allocation3], 4294967040  ;;  %v95_v0 = vmov 0   ;;  %v34_v1 = vld [vmem:[%s155_s1] sm:$0xff]  ;;  %vm29_vm0 = vcmask 7168   ;;  %v96_v2 = vmov 0.0  }
  0x12   :  { %69 = vset.pattern.permute.xlu0 %v95_v0  ;;  %30 = vst.msk [vmem:[%s156_s2] sm:$0xff] %vm29_vm0, %v96_v2  ;;  %31 = vst.msk [vmem:[%s157_s3] sm:$0xff] %vm29_vm0, %v96_v2  ;;  %v32_v3 = vld [vmem:[#allocation2] sm:$0xff]  ;;  %v33_v4 = vld [vmem:[#allocation2 + $0x8] sm:$0xff] }
  0x13   :  { %37 = vperm.xlu0 %69, %v34_v1  }
  0x19   :  { %v42_v12 = vld [vmem:[%s156_s2] sm:$0xff] }
  0x1a   :  { %v49_v14 = vld [vmem:[%s157_s3] sm:$0xff] }
  0x92   :  { %v38_v5 = vpop.permute.xlu0 %37 }
  0x93   :  { %v40_v6 = vsub.f32 %v32_v3, %v38_v5  ;;  %v41_v7 = vsub.f32 %v33_v4, %v38_v5 }
  0x95   :  { %v43_v8 = vadd.f32 %v41_v7, %v40_v6  ;;  %v50_v9 = vmul.f32 %v40_v6, %v40_v6  ;;  %v51_v10 = vmul.f32 %v41_v7, %v41_v7 }
  0x97   :  { %44 = vadd.xlane.f32.xlu0 %v43_v8  ;;  %v52_v11 = vadd.f32 %v51_v10, %v50_v9 }
  0x99   :  { %53 = vadd.xlane.f32.xlu1 %v52_v11 }
 0x124   :  { %v45_v13 = vpop.xlane.xlu0 %44 }
 0x125   :  { %v46_v15 = vadd.f32 %v45_v13, %v42_v12 }
 0x126   :  { %v54_v16 = vpop.xlane.xlu1 %53 }
 0x127   :  { %48 = vst.msk [vmem:[%s156_s2] sm:$0xff] %vm29_vm0, %v46_v15  ;;  %v55_v17 = vadd.f32 %v54_v16, %v49_v14 }
 0x129   :  { %56 = vst.msk [vmem:[%s157_s3] sm:$0xff] %vm29_vm0, %v55_v17 }
 0x12a   :  { %65 = vsyncpa [#allocation3], 1 }

</bundles_post_ra>
